<compile_context>
chip_gen: v7x
topology: tpu7x:2x2x1
jax: 0.10.0
libtpu: 0.0.40
codegen_flags: <defaults>
</compile_context>

<pallas_src>
import jax
import jax.numpy as jnp
from jax.experimental import pallas as pl
from jax.experimental.pallas import tpu as pltpu

_LANE = 128
_SUBLANE = 8


def classifier_kernel(x_ref, w1_ref, b1_ref, w2_ref, b2_ref, o_ref):
    # x arrives as f32 straight from HBM; cast to bf16 in-register so the
    # x-stream stays at 4 B/elem with no separate wrapper pad/cast pass.
    x = x_ref[...].astype(w1_ref.dtype)

    # Hidden layer: h = relu(x @ W1 + b1), bf16 operands, f32 MXU accumulation.
    h = jnp.dot(x, w1_ref[...], preferred_element_type=jnp.float32)
    h = jnp.maximum(h + b1_ref[...], 0.0)

    # Dropout(p=0.2): identity at inference / eval time.
    # TODO(synk): training-mode dropout would use pltpu.prng_seed + prng_random_bits.

    # Output layer: logits = h @ W2 + b2.  N == nb_classes (narrow); the MXU
    # pads lanes internally -- kernel is HBM/overhead-bound, not MXU-bound.
    logits = jnp.dot(h.astype(w2_ref.dtype), w2_ref[...],
                     preferred_element_type=jnp.float32)
    o_ref[...] = (logits + b2_ref[...]).astype(o_ref.dtype)


def _round_up(x, m):
    return ((x + m - 1) // m) * m


def _vmem_capacity_bytes():
    try:
        return int(pltpu.get_tpu_info().vmem_capacity_bytes)
    except Exception:
        return 64 << 20  # conservative fallback: v7x per-TensorCore VMEM


def _weight_vmem_bytes(n_in, n_h_p, nb_classes):
    per_copy = (n_in * n_h_p * 2          # W1 bf16
                + n_h_p * nb_classes * 2  # W2 bf16
                + n_h_p * 4               # b1 f32
                + nb_classes * 4)         # b2 f32
    # Conservative: assume the pipeline double-buffers even constant-index specs.
    return 2 * per_copy


def _stream_vmem_bytes(tb, n_in, n_h_p, nb_classes):
    x_stream = 2 * tb * n_in * 4          # double-buffered f32 input tiles
    out_stream = 2 * tb * nb_classes * 4  # double-buffered f32 output tiles
    temps = 3 * tb * n_h_p * 4            # h (f32) + bf16 copy + slack
    return x_stream + out_stream + temps


def prepare_params(w1, b1, w2, b2, *, compute_dtype=jnp.bfloat16):
    """One-time (out of the hot path) pad of the hidden dim to a lane multiple
    and cast of the weights to bf16.  Zero pad columns/rows are numerically
    inert (relu(0)=0, zero weight rows contribute 0)."""
    n_in, n_h = w1.shape
    n_h_p = _round_up(n_h, _LANE)
    pad_h = n_h_p - n_h
    w1_p = jnp.pad(w1, ((0, 0), (0, pad_h))).astype(compute_dtype)
    b1_p = jnp.pad(jnp.reshape(b1, (1, -1)), ((0, 0), (0, pad_h))).astype(jnp.float32)
    w2_p = jnp.pad(w2, ((0, pad_h), (0, 0))).astype(compute_dtype)
    b2_p = jnp.reshape(b2, (1, -1)).astype(jnp.float32)
    return w1_p, b1_p, w2_p, b2_p


def simple_classifier_forward(x, w1_p, b1_p, w2_p, b2_p, *, block_b=4096):
    """x: [B, n_in] f32; prepared params from prepare_params().
    Returns f32 logits of shape [B, nb_classes]."""
    B, n_in = x.shape
    n_h_p = w1_p.shape[1]
    nb_classes = w2_p.shape[1]

    vmem_budget = (_vmem_capacity_bytes() * 3) // 4   # headroom on every gen
    weight_bytes = _weight_vmem_bytes(n_in, n_h_p, nb_classes)
    if weight_bytes >= vmem_budget:
        # TODO(synk): K/N-tiled fallback with a reduction grid axis for models
        #             whose weights do not fit a single TC's VMEM (v7x: 64 MiB).
        raise ValueError("weights do not fit the VMEM-resident fast path")

    # Batch tile: start big (amortize ~0.35 us per grid step), shrink for VMEM,
    # then rebalance tiles so ragged B does not pad up to ~2x.
    tb = min(block_b, _round_up(B, _SUBLANE))
    while (tb > _SUBLANE and
           weight_bytes + _stream_vmem_bytes(tb, n_in, n_h_p, nb_classes) > vmem_budget):
        tb = _round_up(tb // 2, _SUBLANE)
    n_tiles = pl.cdiv(B, tb)
    tb = _round_up(pl.cdiv(B, n_tiles), _SUBLANE)
    b_p = n_tiles * tb

    # Only pad the batch when strictly required (x stays f32; no cast pass).
    x_p = x if b_p == B else jnp.pad(x, ((0, b_p - B), (0, 0)))

    vmem_limit = min(
        vmem_budget,
        max(weight_bytes + _stream_vmem_bytes(tb, n_in, n_h_p, nb_classes) + (4 << 20),
            32 << 20))

    out = pl.pallas_call(
        classifier_kernel,
        out_shape=jax.ShapeDtypeStruct((b_p, nb_classes), jnp.float32),
        grid=(n_tiles,),
        in_specs=[
            # x streams per batch tile (double-buffered by the pipeline).
            pl.BlockSpec((tb, n_in), lambda i: (i, 0)),
            # Weights/biases: constant index_map -> DMA'd once, VMEM-resident.
            pl.BlockSpec((n_in, n_h_p), lambda i: (0, 0)),
            pl.BlockSpec((1, n_h_p), lambda i: (0, 0)),
            pl.BlockSpec((n_h_p, nb_classes), lambda i: (0, 0)),
            pl.BlockSpec((1, nb_classes), lambda i: (0, 0)),
        ],
        out_specs=pl.BlockSpec((tb, nb_classes), lambda i: (i, 0)),
        compiler_params=pltpu.CompilerParams(
            dimension_semantics=("parallel",),   # megacore-shardable on v7x
            vmem_limit_bytes=int(vmem_limit),
        ),
    )(x_p, w1_p, b1_p, w2_p, b2_p)

    return out if b_p == B else out[:B]


def init_params(key, n_in, n_h, nb_classes):
    """Deterministic, PyTorch-Linear-style uniform init (f32 master params)."""
    k1, k2, k3, k4 = jax.random.split(key, 4)
    lim1 = 1.0 / jnp.sqrt(n_in)
    lim2 = 1.0 / jnp.sqrt(n_h)
    w1 = jax.random.uniform(k1, (n_in, n_h), jnp.float32, -lim1, lim1)
    b1 = jax.random.uniform(k2, (1, n_h), jnp.float32, -lim1, lim1)
    w2 = jax.random.uniform(k3, (n_h, nb_classes), jnp.float32, -lim2, lim2)
    b2 = jax.random.uniform(k4, (1, nb_classes), jnp.float32, -lim2, lim2)
    return w1, b1, w2, b2


if __name__ == "__main__":
    # Small shapes consistent with SimpleClassifier(n_in, n_h, n_h1, nb_classes).
    # (n_h1 is unused by the reference forward pass.)
    B, n_in, n_h, nb_classes = 8, 32, 64, 10

    key = jax.random.PRNGKey(0)
    kx, kp, kx2 = jax.random.split(key, 3)
    x = jax.random.normal(kx, (B, n_in), dtype=jnp.float32)
    w1, b1, w2, b2 = init_params(kp, n_in, n_h, nb_classes)

    # Pad/cast the constant params once, outside the per-call hot path.
    params = prepare_params(w1, b1, w2, b2)

    out = simple_classifier_forward(x, *params)
    out = jax.block_until_ready(out)
    assert out.shape == (B, nb_classes)
    assert out.dtype == jnp.float32

    # Reference with matching bf16-operand / f32-accumulate semantics.
    def ref_bf16(xx, w1_p, b1_p, w2_p, b2_p):
        h = jnp.maximum(
            jnp.dot(xx.astype(jnp.bfloat16), w1_p,
                    preferred_element_type=jnp.float32) + b1_p, 0.0)
        return jnp.dot(h.astype(jnp.bfloat16), w2_p,
                       preferred_element_type=jnp.float32) + b2_p

    ref = ref_bf16(x, *params)
    assert jnp.allclose(out, ref, atol=1e-4, rtol=1e-4)

    # Coarse sanity check against full-f32 math (bf16 operand rounding only).
    ref_f32 = jnp.maximum(x @ w1 + b1, 0.0) @ w2 + b2
    assert jnp.allclose(out, ref_f32, atol=5e-2, rtol=5e-2)

    # Ragged batch (not a sublane multiple): exercises the minimal-padding path.
    B2 = 13
    x2 = jax.random.normal(kx2, (B2, n_in), dtype=jnp.float32)
    out2 = jax.block_until_ready(simple_classifier_forward(x2, *params))
    assert out2.shape == (B2, nb_classes)
    assert jnp.allclose(out2, ref_bf16(x2, *params), atol=1e-4, rtol=1e-4)

    print("KERNEL_OK")
</pallas_src>

<mosaic_0001>
module attributes {stable_mosaic.version = 11 : i64} {
  func.func @classifier_kernel(%arg0: i32, %arg1: memref<8x32xf32, #tpu.memory_space<vmem>>, %arg2: memref<32x128xbf16, #tpu.memory_space<vmem>>, %arg3: memref<1x128xf32, #tpu.memory_space<vmem>>, %arg4: memref<128x10xbf16, #tpu.memory_space<vmem>>, %arg5: memref<1x10xf32, #tpu.memory_space<vmem>>, %arg6: memref<8x10xf32, #tpu.memory_space<vmem>>) attributes {dimension_semantics = [#tpu.dimension_semantics<parallel>], iteration_bounds = array<i64: 1>, scalar_prefetch = 0 : i64, scratch_operands = 0 : i64, tpu.core_type = #tpu.core_type<tc>, window_params = [{transform_indices = @transform_0, window_bounds = array<i64: 8, 32>}, {pipeline_mode = #tpu.pipeline_mode<synchronous>, transform_indices = @transform_1, window_bounds = array<i64: 32, 128>}, {pipeline_mode = #tpu.pipeline_mode<synchronous>, transform_indices = @transform_2, window_bounds = array<i64: 1, 128>}, {pipeline_mode = #tpu.pipeline_mode<synchronous>, transform_indices = @transform_3, window_bounds = array<i64: 128, 10>}, {pipeline_mode = #tpu.pipeline_mode<synchronous>, transform_indices = @transform_4, window_bounds = array<i64: 1, 10>}, {transform_indices = @transform_5, window_bounds = array<i64: 8, 10>}]} {
    %c0 = arith.constant 0 : index
    %c0_0 = arith.constant 0 : index
    %0 = vector.load %arg1[%c0, %c0_0] : memref<8x32xf32, #tpu.memory_space<vmem>>, vector<8x32xf32>
    %1 = arith.truncf %0 : vector<8x32xf32> to vector<8x32xbf16>
    %c0_1 = arith.constant 0 : index
    %c0_2 = arith.constant 0 : index
    %2 = vector.load %arg2[%c0_1, %c0_2] : memref<32x128xbf16, #tpu.memory_space<vmem>>, vector<32x128xbf16>
    %cst = arith.constant dense<0.000000e+00> : vector<8x128xf32>
    %3 = tpu.matmul %1, %2, %cst {dimension_numbers = #tpu.dot_dimension_numbers<[1], [0], [0], [1], [0, 0, 1, 1], [], []>} : vector<8x32xbf16>, vector<32x128xbf16>, vector<8x128xf32> -> vector<8x128xf32>
    %c0_3 = arith.constant 0 : index
    %c0_4 = arith.constant 0 : index
    %4 = vector.load %arg3[%c0_3, %c0_4] : memref<1x128xf32, #tpu.memory_space<vmem>>, vector<1x128xf32>
    %5 = vector.broadcast %4 : vector<1x128xf32> to vector<8x128xf32>
    %6 = arith.addf %3, %5 : vector<8x128xf32>
    %cst_5 = arith.constant 0.000000e+00 : f32
    %7 = vector.broadcast %cst_5 : f32 to vector<8x128xf32>
    %8 = arith.maximumf %6, %7 : vector<8x128xf32>
    %9 = arith.truncf %8 : vector<8x128xf32> to vector<8x128xbf16>
    %c0_6 = arith.constant 0 : index
    %c0_7 = arith.constant 0 : index
    %10 = vector.load %arg4[%c0_6, %c0_7] : memref<128x10xbf16, #tpu.memory_space<vmem>>, vector<128x10xbf16>
    %cst_8 = arith.constant dense<0.000000e+00> : vector<8x10xf32>
    %11 = tpu.matmul %9, %10, %cst_8 {dimension_numbers = #tpu.dot_dimension_numbers<[1], [0], [0], [1], [0, 0, 1, 1], [], []>} : vector<8x128xbf16>, vector<128x10xbf16>, vector<8x10xf32> -> vector<8x10xf32>
    %c0_9 = arith.constant 0 : index
    %c0_10 = arith.constant 0 : index
    %12 = vector.load %arg5[%c0_9, %c0_10] : memref<1x10xf32, #tpu.memory_space<vmem>>, vector<1x10xf32>
    %13 = vector.broadcast %12 : vector<1x10xf32> to vector<8x10xf32>
    %14 = arith.addf %11, %13 : vector<8x10xf32>
    %c0_11 = arith.constant 0 : index
    %c0_12 = arith.constant 0 : index
    %15 = vector.load %arg6[%c0_11, %c0_12] : memref<8x10xf32, #tpu.memory_space<vmem>>, vector<8x10xf32>
    tpu.vector_store %arg6[%c0_11, %c0_12], %14 {strides = array<i32>} : memref<8x10xf32, #tpu.memory_space<vmem>>, vector<8x10xf32>,
    return
  }
  func.func @transform_0(%arg0: i32) -> (i32, i32) {
    %c0_i32 = arith.constant 0 : i32
    %c0_i32_0 = arith.constant 0 : i32
    return %arg0, %c0_i32 : i32, i32
  }
  func.func @transform_1(%arg0: i32) -> (i32, i32) {
    %c0_i32 = arith.constant 0 : i32
    %c0_i32_0 = arith.constant 0 : i32
    %c0_i32_1 = arith.constant 0 : i32
    return %c0_i32, %c0_i32_0 : i32, i32
  }
  func.func @transform_2(%arg0: i32) -> (i32, i32) {
    %c0_i32 = arith.constant 0 : i32
    %c0_i32_0 = arith.constant 0 : i32
    %c0_i32_1 = arith.constant 0 : i32
    return %c0_i32, %c0_i32_0 : i32, i32
  }
  func.func @transform_3(%arg0: i32) -> (i32, i32) {
    %c0_i32 = arith.constant 0 : i32
    %c0_i32_0 = arith.constant 0 : i32
    %c0_i32_1 = arith.constant 0 : i32
    return %c0_i32, %c0_i32_0 : i32, i32
  }
  func.func @transform_4(%arg0: i32) -> (i32, i32) {
    %c0_i32 = arith.constant 0 : i32
    %c0_i32_0 = arith.constant 0 : i32
    %c0_i32_1 = arith.constant 0 : i32
    return %c0_i32, %c0_i32_0 : i32, i32
  }
  func.func @transform_5(%arg0: i32) -> (i32, i32) {
    %c0_i32 = arith.constant 0 : i32
    %c0_i32_0 = arith.constant 0 : i32
    return %arg0, %c0_i32 : i32, i32
  }
}

</mosaic_0001>

<bundles_post_ra>
// kernel: tpu_custom_call.1
= control target key start
LH: loop header
LB: loop body
LE: loop exit
PB: predicated region body
PF: predicated region fallthrough
CT: control target
= control target key end

     0   :  { %v310_v1 = vmov 0.0   ;;  %vm311_vm0 = vmmov 0   ;;  %vm47_vm1 = vcmask 261120   ;;  %s394_s0 = inlined_call_operand.vmem [shape: f32[8,32], index: 0, kind: input, shape index: {}]   ;;  %s395_s1 = inlined_call_operand.vmem [shape: bf16[32,128], index: 1, kind: input, shape index: {}]   ;;  %s396_s2 = inlined_call_operand.vmem [shape: f32[1,128], index: 2, kind: input, shape index: {}]   ;;  %s397_s3 = inlined_call_operand.vmem [shape: bf16[128,10], index: 3, kind: input, shape index: {}]   ;;  %s398_s4 = inlined_call_operand.vmem [shape: f32[1,10], index: 4, kind: input, shape index: {}]   ;;  %s399_s5 = inlined_call_operand.hbm [shape: f32[8,10], index: 5, kind: output, shape index: {}]  }
   0x1   :  { %v276_v0 = vld [vmem:[%s395_s1] sm:$0xff]   ;;  %245 = vmatprep.subr.bf16.mxu0 %v310_v1  ;;  %v277_v2 = vld [vmem:[%s395_s1 + $0x8] sm:$0xff]   ;;  %253 = vmatprep.subr.bf16.mxu1 %v310_v1  ;;  %v280_v7 = vld [vmem:[%s397_s3 + $0x10] sm:$0xff]  }
   0x2   :  { %246 = vmatpush3.bf16.msra.mxu0 %v276_v0  ;;  %249 = vmatprep.mubr.msk.bf16.mxu0 %vm311_vm0, %v310_v1  ;;  %v22_v3 = vld [vmem:[%s394_s0] sm:$0xff]  ;;  %v279_v6 = vld [vmem:[%s397_s3 + $0x8] sm:$0xff]  }
   0x3   :  { %247 = vmatprep.subr.bf16.mxu0 %v310_v1  ;;  %v278_v4 = vld [vmem:[%s397_s3] sm:$0xff]   ;;  %269 = vmatprep.mubr.msk.bf16.mxu1 %vm311_vm0, %v310_v1  ;;  %v23_v5 = vpack.c.bf16 %v22_v3, %v22_v3 }
   0x4   :  { %254 = vmatpush3.bf16.msra.mxu1 %v278_v4 }
   0x5   :  { %255 = vmatprep.subr.bf16.mxu1 %v310_v1 }
   0x6   :  { %248 = vmatpush3.bf16.msra.mxu0 %v277_v2 }
   0x8   :  { %256 = vmatpush3.bf16.msra.mxu1 %v279_v6 }
   0x9   :  { %250 = vmatmul.mubr.msk.bf16.vlgmr.msra.gmra.mrb[0].mxu0 %vm47_vm1, %v23_v5  ;;  %257 = vmatprep.subr.bf16.mxu1 %v310_v1 }
   0xa   :  { %10 = vsyncpa [#allocation3], 0  ;;  %v281_v8 = vld [vmem:[%s397_s3 + $0x18] sm:$0xff]   ;;  %v282_v9 = vld [vmem:[%s397_s3 + $0x20] sm:$0xff]   ;;  %s312_s17 = smov [#allocation2]   ;;  %vm204_vm2 = vcmask 80896  }
   0xb   :  { %v283_v10 = vld [vmem:[%s397_s3 + $0x28] sm:$0xff]   ;;  %v284_v11 = vld [vmem:[%s397_s3 + $0x30] sm:$0xff]   ;;  %v285_v12 = vld [vmem:[%s397_s3 + $0x38] sm:$0xff]   ;;  %s212_s18 = sshll.u32 %s312_s17, 4  ;;  %s213_s18 = int_to_ptr.vmem [resolvable:$true] %s212_s18 }
   0xc   :  { %258 = vmatpush3.bf16.msra.mxu1 %v280_v7  ;;  %v220_v13 = vld [vmem:[%s396_s2] ss:$0 sm:$0xff]  ;;  %s286_s2 = scalar_lea.vmem %s213_s18, 128  ;;  %p291_p1 = scmp.lt.s32.totalorder %s213_s18, %s213_s18 }
   0xd   :  { %259 = vmatprep.subr.bf16.mxu1 %v310_v1  ;;  %v224_v21 = vld [vmem:[%s398_s4] ss:$0 sm:$0xff]  ;;  %p287_p0 = scmp.ne.s32.totalorder %s213_s18, %s286_s2  ;;  %p292_p2 = scmp.lt.s32.totalorder %s286_s2, %s286_s2 }
   0xf   :  { %p293_p3 = por %p292_p2, %p291_p1 }
  0x10   :  { %260 = vmatpush3.bf16.msra.mxu1 %v281_v8 }
  0x11   :  { %261 = vmatprep.subr.bf16.mxu1 %v310_v1  ;;  %p294_p4 = pnand %p293_p3, %p287_p0 }
  0x14   :  { %262 = vmatpush3.bf16.msra.mxu1 %v282_v9 }
  0x15   :  { %263 = vmatprep.subr.bf16.mxu1 %v310_v1 }
  0x18   :  { %264 = vmatpush3.bf16.msra.mxu1 %v283_v10 }
  0x19   :  { %265 = vmatprep.subr.bf16.mxu1 %v310_v1 }
  0x1c   :  { %266 = vmatpush3.bf16.msra.mxu1 %v284_v11 }
  0x1d   :  { %267 = vmatprep.subr.bf16.mxu1 %v310_v1 }
  0x20   :  { %268 = vmatpush3.bf16.msra.mxu1 %v285_v12 }
  0xdc   :  { %v85_v14 = vpop.f32.mrb[0].mxu0 }
  0xdd   :  { %v86_v15 = vadd.f32 %v220_v13, %v85_v14  ;;  %v251_v16 = vpop.f32.mrb[1].mxu0 }
  0xde   :  { %v88_v17 = vpop.f32.mrb[2].mxu0 }
  0xdf   :  { %v91_v18 = vmax.f32 %v86_v15, 0.0  ;;  %v252_v19 = vpop.f32.mrb[3].mxu0 }
  0xe1   :  { %v92_v20 = vpack.c.bf16 %v91_v18, %v91_v18 }
  0xe3   :  { %270 = vmatmul.mubr.bf16.vlgmr.msra.gmra.mrb[0].mxu1 %v92_v20 }
 0x1b6   :  { %v198_v22 = vpop.f32.mrb[0].mxu1 }
 0x1b7   :  { %v199_v23 = vadd.f32 %v224_v21, %v198_v22  ;;  %v271_v24 = vpop.f32.mrb[1].mxu1 }
 0x1b8   :  { %v201_v25 = vpop.f32.mrb[2].mxu1 }
 0x1b9   :  { %v272_v26 = vpop.f32.mrb[3].mxu1  ;;  %205 = vst.msk [vmem:[#allocation2] sm:$0xff] %vm204_vm2, %v199_v23 }
 0x1ba   :  { %297 = shalt.err (!%p294_p4)
}
 0x1bb   :  { %s298_s4 = scalar_lea.hbm %s399_s5, 128 }
 0x1bc   :  { %p299_p5 = scmp.ne.s32.totalorder %s399_s5, %s298_s4  ;;  %p302_p6 = scmp.lt.u32.totalorder %s298_s4, %s399_s5 }
 0x1be   :  { %p304_p7 = pnand %p302_p6, %p299_p5 }
 0x1c0   :  { %307 = shalt.err (!%p304_p7)
}
 0x1c1   :  { %215 = dma.vmem_to_hbm [thread:$0]  %s213_s18, 128, %s399_s5, [#allocation3]  }
 0x1c2   :  { %308 = dma.done.wait [#allocation3], 128  }
 0x1c3   :  { %309 = vsyncadd [#allocation3], 4294967168 }
 0x1c4   :  { %219 = vsyncpa [#allocation3], 1 }

</bundles_post_ra>
